<compile_context>
chip_gen: v5e
topology: v5e:2x2
jax: 0.10.0
libtpu: 0.0.40
codegen_flags: <defaults>
</compile_context>

<pallas_src>
import functools

import numpy as np
import jax
import jax.numpy as jnp
from jax.experimental import pallas as pl
from jax.experimental.pallas import tpu as pltpu


_NEG_INIT = -1e30   # running-max init (finite, so no inf*0 NaNs on the first D step)
_PAD_FILL = -1e9    # replacement for masked lanes; exp() of it underflows to exactly 0


def _cdiv(a, b):
    return (a + b - 1) // b


def _round_up(x, m):
    return _cdiv(x, m) * m


# ---------------------------------------------------------------------------
# Kernel 1: whole class dimension in one tile (common case, no scratch).
# ---------------------------------------------------------------------------
def _ce_loss_kernel_single(student_ref, teacher_ref, loss_ref,
                           *, inv_student_temp, inv_teacher_temp):
    s = student_ref[...].astype(jnp.float32) * inv_student_temp
    t = teacher_ref[...].astype(jnp.float32) * inv_teacher_temp

    s_max = jnp.max(s, axis=-1, keepdims=True)
    t_max = jnp.max(t, axis=-1, keepdims=True)
    s_shift = s - s_max
    t_exp = jnp.exp(t - t_max)

    s_sum = jnp.sum(jnp.exp(s_shift), axis=-1, keepdims=True)
    t_sum = jnp.sum(t_exp, axis=-1, keepdims=True)
    acc = jnp.sum(t_exp * s_shift, axis=-1, keepdims=True)

    # loss_row = log(S) - A / T  ==  -sum_d softmax(t)_d * log_softmax(s)_d
    # (division-free teacher normalization: single per-row divide).
    loss_ref[...] = jnp.log(s_sum) - acc / t_sum


# ---------------------------------------------------------------------------
# Kernel 2: class dimension split across a trailing "arbitrary" grid axis,
# online/streaming softmax with per-row running statistics in VMEM scratch.
# ---------------------------------------------------------------------------
def _ce_loss_kernel_online(student_ref, teacher_ref, loss_ref,
                           s_max_ref, s_sum_ref, t_max_ref, t_sum_ref, acc_ref,
                           *, inv_student_temp, inv_teacher_temp,
                           d_total, d_tile, needs_d_mask):
    """Per row (over the full class dim D):
        T = sum_d exp(t_d - t_max)                 (teacher exp-sum)
        S = sum_d exp(s_d - s_max)                 (student exp-sum)
        A = sum_d exp(t_d - t_max) * (s_d - s_max) (teacher-weighted student shift)
        loss_row = log(S) - A / T
    """
    j = pl.program_id(1)

    @pl.when(j == 0)
    def _init():
        s_max_ref[...] = jnp.full_like(s_max_ref, _NEG_INIT)
        t_max_ref[...] = jnp.full_like(t_max_ref, _NEG_INIT)
        s_sum_ref[...] = jnp.zeros_like(s_sum_ref)
        t_sum_ref[...] = jnp.zeros_like(t_sum_ref)
        acc_ref[...] = jnp.zeros_like(acc_ref)

    s = student_ref[...].astype(jnp.float32) * inv_student_temp
    t = teacher_ref[...].astype(jnp.float32) * inv_teacher_temp

    if needs_d_mask:
        # In-kernel lane masking of the D tail (replaces HBM column padding).
        col = jax.lax.broadcasted_iota(jnp.int32, s.shape, 1) + j * d_tile
        valid = col < d_total
        s = jnp.where(valid, s, _PAD_FILL)
        t = jnp.where(valid, t, _PAD_FILL)

    s_max_old = s_max_ref[...]
    t_max_old = t_max_ref[...]
    s_max_new = jnp.maximum(s_max_old, jnp.max(s, axis=-1, keepdims=True))
    t_max_new = jnp.maximum(t_max_old, jnp.max(t, axis=-1, keepdims=True))
    alpha_s = jnp.exp(s_max_old - s_max_new)
    alpha_t = jnp.exp(t_max_old - t_max_new)
    delta_s = s_max_old - s_max_new

    s_shift = s - s_max_new
    t_exp = jnp.exp(t - t_max_new)          # masked lanes underflow to exactly 0

    # Order matters: the A update consumes the *old* teacher exp-sum.
    acc_ref[...] = (alpha_t * (acc_ref[...] + delta_s * t_sum_ref[...])
                    + jnp.sum(t_exp * s_shift, axis=-1, keepdims=True))
    t_sum_ref[...] = alpha_t * t_sum_ref[...] + jnp.sum(t_exp, axis=-1, keepdims=True)
    s_sum_ref[...] = (alpha_s * s_sum_ref[...]
                      + jnp.sum(jnp.exp(s_shift), axis=-1, keepdims=True))
    s_max_ref[...] = s_max_new
    t_max_ref[...] = t_max_new

    @pl.when(j == pl.num_programs(1) - 1)
    def _finalize():
        loss_ref[...] = jnp.log(s_sum_ref[...]) - acc_ref[...] / t_sum_ref[...]


# ---------------------------------------------------------------------------
# Wrapper
# ---------------------------------------------------------------------------
def _vmem_budgets():
    """Generation-aware (tile_budget_bytes, vmem_limit_bytes)."""
    is_v7 = False
    try:
        kind = jax.devices()[0].device_kind.lower()
        is_v7 = ("v7" in kind) or ("tpu7" in kind)
    except Exception:
        pass
    if is_v7:
        # 64 MiB physical VMEM, ~3.2 TB/s HBM: bigger steps amortize grid overhead.
        return 32 * 1024 * 1024, 48 * 1024 * 1024
    # v5e / v6e: 128 MiB physical but already HBM-bound at 16 MiB tiles.
    return 16 * 1024 * 1024, 32 * 1024 * 1024


def ce_loss_per_row(student_output, teacher_output, *, student_temp, teacher_temp,
                    d_block_max=8192, vmem_tile_budget_bytes=None,
                    vmem_limit_bytes=None):
    """Per-row cross-entropy loss (softmax-teacher branch) via Pallas."""
    B, D = student_output.shape
    assert teacher_output.shape == (B, D)
    itemsize = jnp.dtype(student_output.dtype).itemsize

    if vmem_tile_budget_bytes is None or vmem_limit_bytes is None:
        budget, limit = _vmem_budgets()
        vmem_tile_budget_bytes = vmem_tile_budget_bytes or budget
        vmem_limit_bytes = vmem_limit_bytes or limit

    # Sublane granule: (8,128) tiles for f32, packed (16,128)/(32,128) below 32-bit.
    sub = max(8, 32 // max(itemsize, 1))

    # --- class-dimension (D) tiling: one full tile when it fits, otherwise
    #     balanced lane-aligned tiles (+ online softmax, + in-kernel tail mask).
    if D <= d_block_max:
        TD, grid_d = D, 1
    else:
        n_d_tiles = _cdiv(D, d_block_max)
        TD = _round_up(_cdiv(D, n_d_tiles), 128)
        grid_d = _cdiv(D, TD)
    Dp = grid_d * TD

    # --- row tiling: fix the tile count from the VMEM budget first, then
    #     balance so over-read per tile is < one sublane granule.
    per_row_bytes = 2 * 2 * TD * itemsize + 8 * 512   # 2 inputs x 2 bufs + scratch/out slack
    TB_max = max(sub, (vmem_tile_budget_bytes // per_row_bytes) // sub * sub)
    n_row_tiles = _cdiv(B, TB_max)
    if B >= 2 * sub:
        n_row_tiles = max(n_row_tiles, 2)   # keep both v7x TensorCores busy
    TB = _round_up(_cdiv(B, n_row_tiles), sub)
    grid_rows = _cdiv(B, TB)
    Bp = grid_rows * TB                      # output rows; extra rows sliced off

    inv_s = float(1.0 / student_temp)
    inv_t = float(1.0 / teacher_temp)

    cost = pl.CostEstimate(
        flops=10 * Bp * Dp,
        transcendentals=2 * Bp * Dp,
        bytes_accessed=2 * Bp * Dp * itemsize + Bp * 4,
    )

    if grid_d == 1:
        kernel = functools.partial(_ce_loss_kernel_single,
                                   inv_student_temp=inv_s, inv_teacher_temp=inv_t)
        grid = (grid_rows,)
        in_specs = [pl.BlockSpec((TB, D), lambda i: (i, 0)),
                    pl.BlockSpec((TB, D), lambda i: (i, 0))]
        out_specs = pl.BlockSpec((TB, 1), lambda i: (i, 0))
        scratch_shapes = []
        dims = ("parallel",)
    else:
        kernel = functools.partial(_ce_loss_kernel_online,
                                   inv_student_temp=inv_s, inv_teacher_temp=inv_t,
                                   d_total=D, d_tile=TD,
                                   needs_d_mask=(D % TD != 0))
        grid = (grid_rows, grid_d)
        in_specs = [pl.BlockSpec((TB, TD), lambda i, j: (i, j)),
                    pl.BlockSpec((TB, TD), lambda i, j: (i, j))]
        out_specs = pl.BlockSpec((TB, 1), lambda i, j: (i, 0))
        scratch_shapes = [pltpu.VMEM((TB, 1), jnp.float32)] * 5
        dims = ("parallel", "arbitrary")

    per_row = pl.pallas_call(
        kernel,
        out_shape=jax.ShapeDtypeStruct((Bp, 1), jnp.float32),
        grid_spec=pltpu.PrefetchScalarGridSpec(
            num_scalar_prefetch=0,
            grid=grid,
            in_specs=in_specs,
            out_specs=out_specs,
            scratch_shapes=scratch_shapes,
        ),
        compiler_params=pltpu.CompilerParams(
            dimension_semantics=dims,
            vmem_limit_bytes=vmem_limit_bytes,
        ),
        cost_estimate=cost,
    )(student_output, teacher_output)

    return per_row[:B, 0]


class CELossPallas:
    """Pallas port of loss/ProtoCPC.py::ce_loss (pla='softmax' path)."""

    def __init__(self, out_dim, warmup_teacher_temp, teacher_temp,
                 warmup_teacher_temp_epochs, nepochs, pla, student_temp=0.1):
        self.out_dim = out_dim
        self.student_temp = float(student_temp)
        self.teacher_temp_schedule = np.concatenate((
            np.linspace(warmup_teacher_temp, teacher_temp, warmup_teacher_temp_epochs),
            np.ones(nepochs - warmup_teacher_temp_epochs) * teacher_temp,
        ))
        self.pla = pla
        if pla != 'softmax':
            # TODO(synk): 'sk' branch (sk_uniform) needs dist.all_reduce Sinkhorn
            # iterations across devices; not translated here.
            raise NotImplementedError("only pla='softmax' is implemented in Pallas")

    def __call__(self, student_output, teacher_output, epoch):
        teacher_temp = float(self.teacher_temp_schedule[epoch])
        per_row = ce_loss_per_row(
            student_output, teacher_output,
            student_temp=self.student_temp, teacher_temp=teacher_temp,
        )
        # Final mean over the batch (trivial glue).
        return jnp.mean(per_row)


def _reference(student_output, teacher_output, student_temp, teacher_temp):
    """Pure-JAX reference mirroring the PyTorch forward (softmax branch)."""
    s = student_output.astype(jnp.float32) / student_temp
    t = teacher_output.astype(jnp.float32) / teacher_temp
    t_soft = jax.nn.softmax(t, axis=-1)
    log_soft = jax.nn.log_softmax(s, axis=-1)
    return jnp.mean(jnp.sum(-t_soft * log_soft, axis=-1))


if __name__ == "__main__":
    key = jax.random.PRNGKey(0)
    k1, k2, k3, k4, k5, k6, k7, k8 = jax.random.split(key, 8)

    # --- test 1: small (B, out_dim) logits, single-D-tile fast path, 2 row tiles.
    B, OUT_DIM = 16, 256
    student_output = jax.random.normal(k1, (B, OUT_DIM), dtype=jnp.float32)
    teacher_output = jax.random.normal(k2, (B, OUT_DIM), dtype=jnp.float32)

    loss_mod = CELossPallas(
        out_dim=OUT_DIM,
        warmup_teacher_temp=0.04,
        teacher_temp=0.07,
        warmup_teacher_temp_epochs=10,
        nepochs=100,
        pla='softmax',
        student_temp=0.1,
    )
    epoch = 5
    loss = loss_mod(student_output, teacher_output, epoch)
    jax.block_until_ready(loss)
    ref = _reference(student_output, teacher_output,
                     loss_mod.student_temp,
                     float(loss_mod.teacher_temp_schedule[epoch]))
    np.testing.assert_allclose(np.asarray(loss), np.asarray(ref), rtol=1e-5, atol=1e-5)

    # --- test 2: online-softmax path with row tail (B % 8 != 0) and D tail
    #     (D % TD != 0) handled by in-kernel masking (no HBM padding copies).
    B2, D2 = 13, 320
    s2 = jax.random.normal(k3, (B2, D2), dtype=jnp.float32)
    t2 = jax.random.normal(k4, (B2, D2), dtype=jnp.float32)
    loss2 = jnp.mean(ce_loss_per_row(s2, t2, student_temp=0.1, teacher_temp=0.07,
                                     d_block_max=128))
    jax.block_until_ready(loss2)
    ref2 = _reference(s2, t2, 0.1, 0.07)
    np.testing.assert_allclose(np.asarray(loss2), np.asarray(ref2), rtol=1e-5, atol=1e-5)

    # --- test 3: online-softmax path with evenly dividing D (no tail mask).
    B3, D3 = 32, 512
    s3 = jax.random.normal(k5, (B3, D3), dtype=jnp.float32)
    t3 = jax.random.normal(k6, (B3, D3), dtype=jnp.float32)
    loss3 = jnp.mean(ce_loss_per_row(s3, t3, student_temp=0.1, teacher_temp=0.04,
                                     d_block_max=256))
    jax.block_until_ready(loss3)
    ref3 = _reference(s3, t3, 0.1, 0.04)
    np.testing.assert_allclose(np.asarray(loss3), np.asarray(ref3), rtol=1e-5, atol=1e-5)

    # --- test 4: bf16 logits streamed as-is (half the HBM read traffic),
    #     upcast to f32 inside the kernel.
    B4, D4 = 24, 384
    s4 = jax.random.normal(k7, (B4, D4), dtype=jnp.bfloat16)
    t4 = jax.random.normal(k8, (B4, D4), dtype=jnp.bfloat16)
    loss4 = jnp.mean(ce_loss_per_row(s4, t4, student_temp=0.1, teacher_temp=0.07))
    jax.block_until_ready(loss4)
    ref4 = _reference(s4, t4, 0.1, 0.07)
    np.testing.assert_allclose(np.asarray(loss4), np.asarray(ref4), rtol=1e-4, atol=1e-5)

    print("KERNEL_OK")
</pallas_src>

<mosaic_0001>
module attributes {stable_mosaic.version = 11 : i64} {
  func.func @_ce_loss_kernel_single(%arg0: i32, %arg1: memref<8x256xf32, #tpu.memory_space<vmem>>, %arg2: memref<8x256xf32, #tpu.memory_space<vmem>>, %arg3: memref<8x1xf32, #tpu.memory_space<vmem>>) attributes {dimension_semantics = [#tpu.dimension_semantics<parallel>], iteration_bounds = array<i64: 2>, scalar_prefetch = 0 : i64, scratch_operands = 0 : i64, tpu.core_type = #tpu.core_type<tc>, window_params = [{transform_indices = @transform_0, window_bounds = array<i64: 8, 256>}, {transform_indices = @transform_1, window_bounds = array<i64: 8, 256>}, {transform_indices = @transform_2, window_bounds = array<i64: 8, 1>}]} {
    %c0 = arith.constant 0 : index
    %c0_0 = arith.constant 0 : index
    %0 = vector.load %arg1[%c0, %c0_0] : memref<8x256xf32, #tpu.memory_space<vmem>>, vector<8x256xf32>
    %cst = arith.constant 1.000000e+01 : f32
    %1 = vector.broadcast %cst : f32 to vector<8x256xf32>
    %2 = arith.mulf %0, %1 : vector<8x256xf32>
    %c0_1 = arith.constant 0 : index
    %c0_2 = arith.constant 0 : index
    %3 = vector.load %arg2[%c0_1, %c0_2] : memref<8x256xf32, #tpu.memory_space<vmem>>, vector<8x256xf32>
    %cst_3 = arith.constant 17.6470585 : f32
    %4 = vector.broadcast %cst_3 : f32 to vector<8x256xf32>
    %5 = arith.mulf %3, %4 : vector<8x256xf32>
    %cst_4 = arith.constant dense<0xFF800000> : vector<8xf32>
    %6 = vector.multi_reduction <maximumf>, %2, %cst_4 [1] : vector<8x256xf32> to vector<8xf32>
    %7 = vector.shape_cast %6 : vector<8xf32> to vector<8x1xf32>
    %cst_5 = arith.constant dense<0xFF800000> : vector<8xf32>
    %8 = vector.multi_reduction <maximumf>, %5, %cst_5 [1] : vector<8x256xf32> to vector<8xf32>
    %9 = vector.shape_cast %8 : vector<8xf32> to vector<8x1xf32>
    %10 = vector.broadcast %7 : vector<8x1xf32> to vector<8x256xf32>
    %11 = arith.subf %2, %10 : vector<8x256xf32>
    %12 = vector.broadcast %9 : vector<8x1xf32> to vector<8x256xf32>
    %13 = arith.subf %5, %12 : vector<8x256xf32>
    %14 = math.exp %13 : vector<8x256xf32>
    %15 = math.exp %11 : vector<8x256xf32>
    %cst_6 = arith.constant dense<0.000000e+00> : vector<8xf32>
    %16 = vector.multi_reduction <add>, %15, %cst_6 [1] : vector<8x256xf32> to vector<8xf32>
    %17 = vector.shape_cast %16 : vector<8xf32> to vector<8x1xf32>
    %cst_7 = arith.constant dense<0.000000e+00> : vector<8xf32>
    %18 = vector.multi_reduction <add>, %14, %cst_7 [1] : vector<8x256xf32> to vector<8xf32>
    %19 = vector.shape_cast %18 : vector<8xf32> to vector<8x1xf32>
    %20 = arith.mulf %14, %11 : vector<8x256xf32>
    %cst_8 = arith.constant dense<0.000000e+00> : vector<8xf32>
    %21 = vector.multi_reduction <add>, %20, %cst_8 [1] : vector<8x256xf32> to vector<8xf32>
    %22 = vector.shape_cast %21 : vector<8xf32> to vector<8x1xf32>
    %23 = math.log %17 : vector<8x1xf32>
    %24 = arith.divf %22, %19 : vector<8x1xf32>
    %25 = arith.subf %23, %24 : vector<8x1xf32>
    %c0_9 = arith.constant 0 : index
    %c0_10 = arith.constant 0 : index
    %26 = vector.load %arg3[%c0_9, %c0_10] : memref<8x1xf32, #tpu.memory_space<vmem>>, vector<8x1xf32>
    tpu.vector_store %arg3[%c0_9, %c0_10], %25 {strides = array<i32>} : memref<8x1xf32, #tpu.memory_space<vmem>>, vector<8x1xf32>,
    return
  }
  func.func @transform_0(%arg0: i32) -> (i32, i32) {
    %c0_i32 = arith.constant 0 : i32
    %c0_i32_0 = arith.constant 0 : i32
    return %arg0, %c0_i32 : i32, i32
  }
  func.func @transform_1(%arg0: i32) -> (i32, i32) {
    %c0_i32 = arith.constant 0 : i32
    %c0_i32_0 = arith.constant 0 : i32
    return %arg0, %c0_i32 : i32, i32
  }
  func.func @transform_2(%arg0: i32) -> (i32, i32) {
    %c0_i32 = arith.constant 0 : i32
    %c0_i32_0 = arith.constant 0 : i32
    return %arg0, %c0_i32 : i32, i32
  }
}

</mosaic_0001>

<bundles_post_ra>
// kernel: tpu_custom_call.1
= control target key start
LH: loop header
LB: loop body
LE: loop exit
PB: predicated region body
PF: predicated region fallthrough
CT: control target
= control target key end

     0   :  { %7 = vsyncpa [#allocation3], 0  ;;  %s661_s0 = inlined_call_operand.hbm [shape: f32[16,256], index: 0, kind: input, shape index: {}]   ;;  %s662_s1 = inlined_call_operand.hbm [shape: f32[16,256], index: 1, kind: input, shape index: {}]   ;;  %s663_s2 = inlined_call_operand.vmem [shape: f32[16,1], index: 2, kind: output, shape index: {}]  }
   0x1   :  { %9 = vsyncpa [#allocation3 + $0x1], 0 }
   0x2   :  { %10 = vsyncpa [#allocation5], 0 }
   0x3   :  { %12 = vsyncpa [#allocation5 + $0x1], 0  ;;  %s535_s9 = smov 0   ;;  %s537_s10 = smov 0  }
   0x4   :  { %s539_s11 = smov 0   ;;  %s541_s12 = smov 0  }
   0x5 LB: > { %s554_s13 = sadd.s32 4294967295, %s518_s12   ;;  %s557_s14 = sadd.s32 1, %s518_s12   ;;  %s518_s12 = sphi %s541_s12, %s671_s12   ;;  %s514_s11 = sphi %s539_s11, %s670_s11   ;;  %s510_s10 = sphi %s537_s10, %s669_s10   ;;  %s506_s9 = sphi %s535_s9, %s668_s9  }
   0x6   : > { %s22_s15 = ssub.s32 %s518_s12, %s557_s14  ;;  %s25_s16 = sadd.s32 1, %s514_s11 }
   0x7   : > { %p23_p0 = scmp.eq.s32.totalorder %s22_s15, 0  ;;  %p32_p1 = scmp.ne.s32.totalorder %s514_s11, %s510_s10 }
   0x8   : > { %p33_p2 = scmp.eq.s32.totalorder %s518_s12, 0  ;;  %p38_p3 = scmp.ne.s32.totalorder %s510_s10, %s506_s9 }
   0x9   : > { %s567_s17 = scalar_select %p23_p0, %s514_s11, %s25_s16  }
   0xa   : > { %p569_p4 = por %p33_p2, %p32_p1  ;;  %p39_p5 = scmp.eq.s32.totalorder %s554_s13, 0 }
   0xb   : > { %p375_p6 = scmp.lt.s32.totalorder %s518_s12, 2  ;;  %s580_s20 = sand.u32 1, %s514_s11  }
   0xc   : > { %p575_p7 = por %p39_p5, %p38_p3  ;;  %s350_s21 = sshll.u32 %s580_s20, 4 }
   0xd   : > { %s362_s22 = sshll.u32 %s518_s12, 4  ;;  %s118_s26 = scalar_lea.vmem [#allocation2], %s350_s21 }
   0xe   : > { %s123_s25 = scalar_lea.hbm %s661_s0, %s362_s22  ;;  %s127_s27 = sshll.u32 %s118_s26, 4  ;;  %s128_s27 = int_to_ptr.vmem [resolvable:$true] %s127_s27 }
   0xf   : > { %s125_s28 = sshll.u32 %s123_s25, 4  ;;  %p589_p8 = pnand %p375_p6, %p569_p4  ;;  %s126_s28 = int_to_ptr.hbm [resolvable:$true] %s125_s28 }
  0x10   : > { %p356_p9 = scmp.ge.s32.totalorder %s518_s12, 1  ;;  %p152_p10 = scmp.lt.s32.totalorder %s518_s12, 3 }
  0x11   : > { %s115_s30 = scalar_lea.sflag [#allocation3], %s580_s20  ;;  %s420_s3 = sshra.s32 %s126_s28, 4  ;;  %s421_s3 = int_to_ptr.hbm [resolvable:$true] %s420_s3 }
  0x12   : > { %s422_s4 = scalar_lea.hbm %s421_s3, 16  ;;  %p424_p12 = pneg %p589_p8 }
  0x13   : > { %p423_p11 = scmp.ne.s32.totalorder %s421_s3, %s422_s4  ;;  %s427_s7 = scalar_lea.hbm %s661_s0, 32 }
  0x14   : > { %p428_p1 = scmp.lt.s32.totalorder %s421_s3, %s661_s0  ;;  %p429_p2 = scmp.lt.s32.totalorder %s427_s7, %s422_s4 }
  0x15   : > { %p425_p13 = pnand %p424_p12, %p423_p11 }
  0x16   : > { %p430_p3 = por %p429_p2, %p428_p1 }
  0x17   : > { %p426_p0 = pneg %p425_p13 }
  0x19   : > { %p431_p4 = pnand %p430_p3, %p426_p0 }
  0x1b   : > { %434 = shalt.err (!%p431_p4)
}
  0x1c   : > { %371 = dma.hbm_to_vmem [thread:$0]  (!%p589_p8), %s126_s28, 256, %s128_s27, %s115_s30  }
  0x1d   : > { %p613_p5 = pnand %p356_p9, %p152_p10  ;;  %s143_s23 = scalar_lea.hbm %s662_s1, %s362_s22 }
  0x1e   : > { %s138_s24 = scalar_lea.vmem [#allocation4], %s350_s21  ;;  %s145_s26 = sshll.u32 %s143_s23, 4  ;;  %s146_s26 = int_to_ptr.hbm [resolvable:$true] %s145_s26 }
  0x1f   : > { %s147_s25 = sshll.u32 %s138_s24, 4  ;;  %s135_s3 = scalar_lea.sflag [#allocation5], %s580_s20  ;;  %s148_s25 = int_to_ptr.vmem [resolvable:$true] %s147_s25 }
  0x20   : > { %s450_s4 = sshra.s32 %s146_s26, 4  ;;  %s457_s28 = scalar_lea.hbm %s662_s1, 32  ;;  %s451_s4 = int_to_ptr.hbm [resolvable:$true] %s450_s4 }
  0x21   : > { %s452_s5 = scalar_lea.hbm %s451_s4, 16  ;;  %p458_p11 = scmp.lt.s32.totalorder %s451_s4, %s662_s1 }
  0x22   : > { %p453_p6 = scmp.ne.s32.totalorder %s451_s4, %s452_s5  ;;  %p459_p13 = scmp.lt.s32.totalorder %s457_s28, %s452_s5 }
  0x24   : > { %p455_p9 = pnand %p453_p6, %p424_p12  ;;  %p460_p0 = por %p459_p13, %p458_p11 }
  0x26   : > { %p456_p10 = pneg %p455_p9 }
  0x28   : > { %p461_p1 = pnand %p460_p0, %p456_p10 }
  0x2a   : > { %464 = shalt.err (!%p461_p1)
}
  0x2b   : > { %374 = dma.hbm_to_vmem [thread:$0]  (!%p589_p8), %s146_s26, 256, %s148_s25, %s135_s3  }
  0x2c   : > { %156 = sbr.rel (%p613_p5) target bundleno = 325 (0x145), region = 28  ;;  %s158_s20 = sand.u32 (!%p613_p5), 1, %s510_s10  }
  0x2d   : > { %s357_s21 = sshll.u32 (!%p613_p5), %s158_s20, 4  ;;  %s159_s6 = scalar_lea.sflag (!%p613_p5), [#allocation3], %s158_s20 }
  0x2e   : > { %s162_s7 = scalar_lea.vmem (!%p613_p5), [#allocation2], %s357_s21 }
  0x31   : > { %497 = dma.done.wait (%p575_p7), %s159_s6, 256  }
  0x32   : > { %499 = vsyncadd (%p575_p7), %s159_s6, 4294967040  ;;  %s169_s8 = scalar_lea.sflag [#allocation5], %s158_s20  ;;  %s172_s9 = scalar_lea.vmem [#allocation4], %s357_s21 }
  0x33   : > { %501 = dma.done.wait (%p575_p7), %s169_s8, 256  }
  0x34   : > { %503 = vsyncadd (%p575_p7), %s169_s8, 4294967040  ;;  %v206_v0 = vld [vmem:[%s172_s9] sm:$0xff]  ;;  %v207_v1 = vld [vmem:[%s172_s9 + $0x8] sm:$0xff]  ;;  %p198_p7 = scmp.lt.s32.totalorder %s554_s13, 1  ;;  %vm257_vm4 = vcmask 7168  }
  0x35   : > { %v208_v2 = vmul.f32 17.647058, %v206_v0  ;;  %v209_v3 = vmul.f32 17.647058, %v207_v1  ;;  %v202_v4 = vld [vmem:[%s162_s7] sm:$0xff]  ;;  %v203_v5 = vld [vmem:[%s162_s7 + $0x8] sm:$0xff] }
  0x36   : > { %v204_v7 = vmul.f32 10.0, %v202_v4  ;;  %v205_v8 = vmul.f32 10.0, %v203_v5  ;;  %s673_s13 = smov (!%p198_p7, %s554_s13), 1 }
  0x37   : > { %v213_v6 = vmax.f32 %v208_v2, %v209_v3  ;;  %s359_s19 = sshll.u32 %s673_s13, 3 }
  0x38   : > { %v210_v9 = vmax.f32 %v204_v7, %v205_v8  ;;  %s201_s16 = scalar_lea.vmem %s663_s2, %s359_s19 }
  0x39   : > { %214 = vmax.xlane.f32.xlu0 %v213_v6 }
  0x41   : > { %211 = vmax.xlane.f32.xlu0 %v210_v9 }
  0xac   : > { %v215_v10 = vpop.xlane.xlu0 %214 }
  0xad   : > { %v218_v11 = vsub.f32 %v208_v2, %v215_v10  ;;  %v219_v12 = vsub.f32 %v209_v3, %v215_v10 }
  0xaf   : > { %v220_v13 = vmul.f32 1.442695, %v218_v11  ;;  %v222_v14 = vmul.f32 1.442695, %v219_v12 }
  0xb1   : > { %408 = vpow2.f32 %v220_v13 }
  0xb2   : > { %410 = vpow2.f32 %v222_v14 }
  0xb4   : > { %v212_v15 = vpop.xlane.xlu0 %211 }
  0xb5   : > { %v216_v16 = vsub.f32 %v204_v7, %v212_v15  ;;  %v217_v17 = vsub.f32 %v205_v8, %v212_v15 }
  0xb7   : > { %v409_v18 = vpop.eup %408  ;;  %v224_v19 = vmul.f32 1.442695, %v216_v16  ;;  %v226_v20 = vmul.f32 1.442695, %v217_v17 }
  0xb8   : > { %v411_v21 = vpop.eup %410  ;;  %v234_v22 = vmul.f32 %v409_v18, %v216_v16 }
  0xb9   : > { %412 = vpow2.f32 %v224_v19  ;;  %v231_v23 = vadd.f32 %v411_v21, %v409_v18  ;;  %v235_v24 = vmul.f32 %v411_v21, %v217_v17 }
  0xba   : > { %414 = vpow2.f32 %v226_v20 }
  0xbb   : > { %232 = vadd.xlane.f32.xlu1 %v231_v23  ;;  %v236_v25 = vadd.f32 %v235_v24, %v234_v22 }
  0xbd   : > { %237 = vadd.xlane.f32.xlu2 %v236_v25 }
  0xbf   : > { %v413_v26 = vpop.eup %412 }
  0xc0   : > { %v415_v27 = vpop.eup %414 }
  0xc1   : > { %v228_v28 = vadd.f32 %v415_v27, %v413_v26 }
  0xc3   : > { %229 = vadd.xlane.f32.xlu1 %v228_v28 }
 0x12e   : > { %v233_v29 = vpop.xlane.xlu1 %232 }
 0x12f   : > { %416 = vrcp.f32 %v233_v29  ;;  %v252_v34 = vand.u32 2147483648, %v233_v29  ;;  %v250_v36 = vand.u32 2147483647, %v233_v29  ;;  %vm246_vm1 = vweird.f32 %v233_v29 }
 0x130   : > { %v238_v43 = vpop.xlane.xlu2 %237 }
 0x131   : > { %v253_v39 = vor.u32 1.1754944e-38, %v252_v34  ;;  %vm251_vm3 = vcmp.eq.f32.partialorder %v250_v36, 8.507059e+37 }
 0x135   : > { %v417_v30 = vpop.eup %416 }
 0x136   : > { %v242_v31 = vmul.f32 %v417_v30, %v233_v29  ;;  %v230_v32 = vpop.xlane.xlu1 %229  ;;  %vm247_vm0 = vweird.f32 %v417_v30 }
 0x137   : > { %418 = vlog2.f32 %v230_v32  ;;  %vm248_vm2 = vmor %vm246_vm1, %vm247_vm0 }
 0x138   : > { %v243_v33 = vsub.f32 1.0, %v242_v31 }
 0x13a   : > { %v244_v35 = vmul.f32 %v417_v30, %v243_v33 }
 0x13c   : > { %v245_v37 = vadd.f32 %v417_v30, %v244_v35 }
 0x13d   : > { %v419_v38 = vpop.eup %418 }
 0x13e   : > { %v249_v40 = vsel %vm248_vm2, %v417_v30, %v245_v37  ;;  %v240_v41 = vmul.f32 0.6931472, %v419_v38 }
 0x13f   : > { %v254_v42 = vsel %vm251_vm3, %v253_v39, %v249_v40 }
 0x140   : > { %v255_v44 = vmul.f32 %v254_v42, %v238_v43 }
 0x142   : > { %v256_v45 = vsub.f32 %v240_v41, %v255_v44 }
 0x144   : > { %258 = vst.msk [vmem:[%s201_s16] sm:$0xff] %vm257_vm4, %v256_v45 }
 0x145 PF: > { %p15_p8 = scmp.ge.s32.totalorder %s557_s14, 4   ;;  %s668_s9 = smov %s510_s10 }
 0x146   : > { %s669_s10 = smov %s514_s11  ;;  %s670_s11 = smov %s567_s17 }
 0x147   : > { %s671_s12 = smov %s557_s14  ;;  %17 = sbr.rel (!%p15_p8) target bundleno = 5 (0x5), region = 81 }
 0x14c   :  { %278 = vsyncpa [#allocation3], 1 }
 0x14d   :  { %280 = vsyncpa [#allocation3 + $0x1], 1 }
 0x14e   :  { %281 = vsyncpa [#allocation5], 1 }
 0x14f   :  { %283 = vsyncpa [#allocation5 + $0x1], 1 }

</bundles_post_ra>
